<compile_context>
chip_gen: v7x
topology: tpu7x:2x2x1
jax: 0.10.0
libtpu: 0.0.40
codegen_flags: <defaults>
</compile_context>

<pallas_src>
import jax
import jax.numpy as jnp
from jax.experimental import pallas as pl
from jax.experimental.pallas import tpu as pltpu


# ------------------------------- constants -----------------------------------
HEAD_DIMS = (11, 3, 3, 3)            # offload / resolution / bitrate / model
NUM_LOGITS = sum(HEAD_DIMS)          # 20
H1, H2 = 64, 32                      # hidden sizes of both backbones
LANES = 128                          # TPU lane width (f32)
TB_MAX = 2048                        # batch-tile cap (fits v5e 16 MiB scoped VMEM)

# packed-output column layout (total 54 used columns, padded to 128)
LOGITS_OFF = 0
AUX_OFF = NUM_LOGITS                 # 20
VALUE_OFF = NUM_LOGITS + 1           # 21
FEAT_OFF = NUM_LOGITS + 2            # 22
FEAT_END = FEAT_OFF + H2             # 54


def _round_up(x, m):
    return (x + m - 1) // m * m


def _cdiv(a, b):
    return -(-a // b)


def _tile_batch(B):
    """Pick (TB, B_pad): rows rounded to 16 (bf16 sublanes), >=2 grid steps when
    possible (v7x dual-TC sharding of the 'parallel' axis), TB capped at 2048."""
    b16 = _round_up(max(B, 16), 16)
    tb = min(TB_MAX, _round_up(_cdiv(b16, 2), 16))
    b_pad = _round_up(b16, tb)
    return tb, b_pad


# ----------------------------- Pallas kernel ---------------------------------
def _actor_critic_kernel(xa_ref, xc_ref, w1a_ref, w1c_ref, b1_ref,
                         w2_ref, b2_ref, w3_ref, b3_ref, out_ref):
    """xa:(TB,Da) bf16, xc:(TB,Dc) bf16 ->
    out:(TB,128) f32 = [logits(20) | aux(1) | value(1) | feat(32) | pad]."""
    f32 = jnp.float32
    # Streamed bf16 activations -> f32 (tiny VPU cast; all math stays f32).
    xa = xa_ref[...].astype(f32)
    xc = xc_ref[...].astype(f32)
    # layer 1 (actor cols 0:64, critic cols 64:128), two small matmuls summed
    z1 = (jnp.dot(xa, w1a_ref[...], preferred_element_type=f32)
          + jnp.dot(xc, w1c_ref[...], preferred_element_type=f32)
          + b1_ref[...])
    h1 = jnp.tanh(z1)
    # layer 2 (block-diag actor|critic): (TB, 128) @ (128, 128)
    h2 = jnp.tanh(jnp.dot(h1, w2_ref[...], preferred_element_type=f32) + b2_ref[...])
    # fused action heads + aux value + critic-out + identity feature passthrough;
    # availability mask already folded additively (-1e10) into b3.
    out_ref[...] = jnp.dot(h2, w3_ref[...], preferred_element_type=f32) + b3_ref[...]


# ------------------------------ host wrapper ----------------------------------
@jax.jit
def actor_critic_forward(state, critic_state, avail, packed):
    """Returns (logits(B,20), aux_value(B,1), critic_value(B,1), actor_feat(B,32))."""
    B, Da = state.shape
    Dc = critic_state.shape[1]

    TB, B_pad = _tile_batch(B)

    # bf16 streamed activations (only precision change; weights/compute stay f32)
    xa = jnp.pad(state.astype(jnp.bfloat16), ((0, B_pad - B), (0, 0)))
    xc = jnp.pad(critic_state.astype(jnp.bfloat16), ((0, B_pad - B), (0, 0)))

    # fold availability mask (1, 20) additively into the fused output bias
    mask = jnp.zeros((1, LANES), jnp.float32)
    mask = mask.at[:, :NUM_LOGITS].set(
        jnp.where(avail == 0, jnp.float32(-1e10), jnp.float32(0.0)))
    b3 = packed["b3"] + mask
    # TODO(synk): per-sample available_actions (B, 20) would need to be streamed
    # as an extra (TB, 128) kernel input (budget +~256 B/row) instead of being
    # folded into the broadcast bias.

    grid = (B_pad // TB,)
    out = pl.pallas_call(
        _actor_critic_kernel,
        out_shape=jax.ShapeDtypeStruct((B_pad, LANES), jnp.float32),
        grid_spec=pl.GridSpec(
            grid=grid,
            in_specs=[
                pl.BlockSpec((TB, Da), lambda i: (i, 0)),       # actor state (streamed)
                pl.BlockSpec((TB, Dc), lambda i: (i, 0)),       # critic state (streamed)
                pl.BlockSpec((Da, LANES), lambda i: (0, 0)),    # w1 actor cols (resident)
                pl.BlockSpec((Dc, LANES), lambda i: (0, 0)),    # w1 critic cols (resident)
                pl.BlockSpec((1, LANES), lambda i: (0, 0)),     # b1
                pl.BlockSpec((LANES, LANES), lambda i: (0, 0)), # w2 (resident)
                pl.BlockSpec((1, LANES), lambda i: (0, 0)),     # b2
                pl.BlockSpec((LANES, LANES), lambda i: (0, 0)), # w3 fused heads (resident)
                pl.BlockSpec((1, LANES), lambda i: (0, 0)),     # b3 (+mask)
            ],
            out_specs=pl.BlockSpec((TB, LANES), lambda i: (i, 0)),
        ),
        compiler_params=pltpu.CompilerParams(
            dimension_semantics=("parallel",),   # v7x: shard batch over 2 TCs
            # TB<=2048 keeps double-buffered slabs ~5 MiB, under all scoped-VMEM defaults.
        ),
        cost_estimate=pl.CostEstimate(
            flops=2 * B_pad * LANES * (Da + Dc + 2 * LANES),
            transcendentals=2 * B_pad * LANES,
            bytes_accessed=(2 * B_pad * (Da + Dc)            # bf16 streamed inputs
                            + 4 * B_pad * LANES              # f32 output slab
                            + 4 * ((Da + Dc + 2 * LANES) * LANES + 3 * LANES)),
        ),
    )(xa, xc, packed["w1a"], packed["w1c"], packed["b1"],
      packed["w2"], packed["b2"], packed["w3"], b3)

    logits = out[:B, LOGITS_OFF:LOGITS_OFF + NUM_LOGITS]
    aux = out[:B, AUX_OFF:AUX_OFF + 1]
    value = out[:B, VALUE_OFF:VALUE_OFF + 1]
    feat = out[:B, FEAT_OFF:FEAT_END]
    return logits, aux, value, feat


def sample_actions(key, logits):
    """Plain-JAX glue emulating FixedCategorical.sample() / .log_probs()."""
    actions, logps = [], []
    off = 0
    for i, d in enumerate(HEAD_DIMS):
        head_logits = logits[:, off:off + d]
        off += d
        k = jax.random.fold_in(key, i)
        a = jax.random.categorical(k, head_logits, axis=-1)            # (B,)
        logp = jnp.take_along_axis(jax.nn.log_softmax(head_logits, axis=-1),
                                   a[:, None], axis=-1)                # (B,1)
        actions.append(a[:, None])
        logps.append(logp)
    return jnp.concatenate(actions, axis=-1), jnp.concatenate(logps, axis=-1)


# ----------------------- parameter init & block packing ----------------------
def _linear(key, fan_in, fan_out):
    # PyTorch default: U(-1/sqrt(fan_in), 1/sqrt(fan_in)); stored as (in, out).
    kw, kb = jax.random.split(key)
    bound = 1.0 / jnp.sqrt(jnp.float32(fan_in))
    w = jax.random.uniform(kw, (fan_in, fan_out), jnp.float32, -bound, bound)
    b = jax.random.uniform(kb, (1, fan_out), jnp.float32, -bound, bound)
    return w, b


def init_params(key, actor_state_dim, critic_state_dim):
    """Per-layer parameters matching the PyTorch module's Linear layers."""
    keys = jax.random.split(key, 10)
    p = {}
    p["w1"], p["b1"] = _linear(keys[0], actor_state_dim, H1)
    p["w2"], p["b2"] = _linear(keys[1], H1, H2)
    head_ws, head_bs = [], []
    for i, d in enumerate(HEAD_DIMS):
        w, b = _linear(keys[2 + i], H2, d)
        head_ws.append(w)
        head_bs.append(b)
    p["wh"] = jnp.concatenate(head_ws, axis=1)      # (32, 20)
    p["bh"] = jnp.concatenate(head_bs, axis=1)      # (1, 20)
    p["waux"], p["baux"] = _linear(keys[6], H2, 1)
    p["wc1"], p["bc1"] = _linear(keys[7], critic_state_dim, H1)
    p["wc2"], p["bc2"] = _linear(keys[8], H1, H2)
    p["wc3"], p["bc3"] = _linear(keys[9], H2, 1)
    return p


def pack_params(raw, actor_state_dim, critic_state_dim):
    """Build the block-structured, lane-dense weight slabs (done once)."""
    Da, Dc = actor_state_dim, critic_state_dim

    # layer 1: actor weights feed columns 0:64, critic weights feed 64:128
    w1a = jnp.zeros((Da, LANES), jnp.float32).at[:, :H1].set(raw["w1"])
    w1c = jnp.zeros((Dc, LANES), jnp.float32).at[:, H1:2 * H1].set(raw["wc1"])
    b1 = jnp.zeros((1, LANES), jnp.float32)
    b1 = b1.at[:, :H1].set(raw["b1"]).at[:, H1:2 * H1].set(raw["bc1"])

    w2 = jnp.zeros((LANES, LANES), jnp.float32)
    w2 = w2.at[:H1, :H2].set(raw["w2"])
    w2 = w2.at[H1:2 * H1, H2:2 * H2].set(raw["wc2"])
    b2 = jnp.zeros((1, LANES), jnp.float32)
    b2 = b2.at[:, :H2].set(raw["b2"]).at[:, H2:2 * H2].set(raw["bc2"])

    w3 = jnp.zeros((LANES, LANES), jnp.float32)
    w3 = w3.at[:H2, LOGITS_OFF:LOGITS_OFF + NUM_LOGITS].set(raw["wh"])
    w3 = w3.at[:H2, AUX_OFF:AUX_OFF + 1].set(raw["waux"])
    w3 = w3.at[H2:2 * H2, VALUE_OFF:VALUE_OFF + 1].set(raw["wc3"])
    w3 = w3.at[:H2, FEAT_OFF:FEAT_END].set(jnp.eye(H2, dtype=jnp.float32))
    b3 = jnp.zeros((1, LANES), jnp.float32)
    b3 = b3.at[:, LOGITS_OFF:LOGITS_OFF + NUM_LOGITS].set(raw["bh"])
    b3 = b3.at[:, AUX_OFF:AUX_OFF + 1].set(raw["baux"])
    b3 = b3.at[:, VALUE_OFF:VALUE_OFF + 1].set(raw["bc3"])

    return {"w1a": w1a, "w1c": w1c, "b1": b1, "w2": w2, "b2": b2,
            "w3": w3, "b3": b3}


# --------------------------- pure-JAX reference -------------------------------
def reference_forward(state, critic_state, avail, raw):
    h1 = jnp.tanh(state @ raw["w1"] + raw["b1"])
    h2 = jnp.tanh(h1 @ raw["w2"] + raw["b2"])
    logits = h2 @ raw["wh"] + raw["bh"] + jnp.where(avail == 0, -1e10, 0.0)
    aux = h2 @ raw["waux"] + raw["baux"]
    c1 = jnp.tanh(critic_state @ raw["wc1"] + raw["bc1"])
    c2 = jnp.tanh(c1 @ raw["wc2"] + raw["bc2"])
    value = c2 @ raw["wc3"] + raw["bc3"]
    return logits, aux, value, h2


# ----------------------------------- main -------------------------------------
if __name__ == "__main__":
    B = 2
    ACTOR_STATE_DIM = 16
    CRITIC_STATE_DIM = 32

    root = jax.random.PRNGKey(0)
    k_param, k_state, k_cstate, k_sample = jax.random.split(root, 4)

    raw_params = init_params(k_param, ACTOR_STATE_DIM, CRITIC_STATE_DIM)
    packed_params = pack_params(raw_params, ACTOR_STATE_DIM, CRITIC_STATE_DIM)

    state = jax.random.normal(k_state, (B, ACTOR_STATE_DIM), jnp.float32)
    # evaluate_value flattens the critic input; build it already flat here.
    critic_state = jax.random.normal(k_cstate, (B, CRITIC_STATE_DIM), jnp.float32)
    # available_actions: (1, 20) broadcast mask (1 = allowed); disable two actions.
    avail = jnp.ones((1, NUM_LOGITS), jnp.float32).at[0, 3].set(0.0).at[0, 12].set(0.0)

    logits, aux_value, critic_value, actor_feat = jax.block_until_ready(
        actor_critic_forward(state, critic_state, avail, packed_params)
    )

    # Correctness check against the plain-JAX reference of the PyTorch module.
    # The kernel quantizes the streamed inputs to bf16 (deliberate, mem-bound
    # optimization); feed the reference the same bf16-rounded inputs so the
    # remaining difference is only f32 accumulation order (tight tolerance),
    # and also sanity-check against the exact-f32 reference loosely.
    state_q = state.astype(jnp.bfloat16).astype(jnp.float32)
    critic_q = critic_state.astype(jnp.bfloat16).astype(jnp.float32)
    ref_logits, ref_aux, ref_value, ref_feat = reference_forward(
        state_q, critic_q, avail, raw_params)
    assert bool(jnp.allclose(logits, ref_logits, rtol=1e-4, atol=1e-4))
    assert bool(jnp.allclose(aux_value, ref_aux, rtol=1e-4, atol=1e-4))
    assert bool(jnp.allclose(critic_value, ref_value, rtol=1e-4, atol=1e-4))
    assert bool(jnp.allclose(actor_feat, ref_feat, rtol=1e-4, atol=1e-4))

    f32_logits, f32_aux, f32_value, f32_feat = reference_forward(
        state, critic_state, avail, raw_params)
    assert bool(jnp.allclose(logits, f32_logits, rtol=3e-2, atol=3e-2))
    assert bool(jnp.allclose(aux_value, f32_aux, rtol=3e-2, atol=3e-2))
    assert bool(jnp.allclose(critic_value, f32_value, rtol=3e-2, atol=3e-2))
    assert bool(jnp.allclose(actor_feat, f32_feat, rtol=3e-2, atol=3e-2))

    actions, action_log_probs = sample_actions(k_sample, logits)
    jax.block_until_ready((actions, action_log_probs))

    # quick sanity checks
    assert logits.shape == (B, NUM_LOGITS)
    assert aux_value.shape == (B, 1)
    assert critic_value.shape == (B, 1)
    assert actor_feat.shape == (B, H2)
    assert actions.shape == (B, 4)
    assert action_log_probs.shape == (B, 4)
    assert bool(jnp.all(logits[:, 3] <= -1e9)) and bool(jnp.all(logits[:, 12] <= -1e9))

    print("KERNEL_OK")
</pallas_src>

<mosaic_0001>
module attributes {stable_mosaic.version = 11 : i64} {
  func.func @_actor_critic_kernel(%arg0: i32, %arg1: memref<16x16xbf16, #tpu.memory_space<vmem>>, %arg2: memref<16x32xbf16, #tpu.memory_space<vmem>>, %arg3: memref<16x128xf32, #tpu.memory_space<vmem>>, %arg4: memref<32x128xf32, #tpu.memory_space<vmem>>, %arg5: memref<1x128xf32, #tpu.memory_space<vmem>>, %arg6: memref<128x128xf32, #tpu.memory_space<vmem>>, %arg7: memref<1x128xf32, #tpu.memory_space<vmem>>, %arg8: memref<128x128xf32, #tpu.memory_space<vmem>>, %arg9: memref<1x128xf32, #tpu.memory_space<vmem>>, %arg10: memref<16x128xf32, #tpu.memory_space<vmem>>) attributes {dimension_semantics = [#tpu.dimension_semantics<parallel>], iteration_bounds = array<i64: 1>, scalar_prefetch = 0 : i64, scratch_operands = 0 : i64, tpu.core_type = #tpu.core_type<tc>, window_params = [{transform_indices = @transform_0, window_bounds = array<i64: 16, 16>}, {transform_indices = @transform_1, window_bounds = array<i64: 16, 32>}, {pipeline_mode = #tpu.pipeline_mode<synchronous>, transform_indices = @transform_2, window_bounds = array<i64: 16, 128>}, {pipeline_mode = #tpu.pipeline_mode<synchronous>, transform_indices = @transform_3, window_bounds = array<i64: 32, 128>}, {pipeline_mode = #tpu.pipeline_mode<synchronous>, transform_indices = @transform_4, window_bounds = array<i64: 1, 128>}, {pipeline_mode = #tpu.pipeline_mode<synchronous>, transform_indices = @transform_5, window_bounds = array<i64: 128, 128>}, {pipeline_mode = #tpu.pipeline_mode<synchronous>, transform_indices = @transform_6, window_bounds = array<i64: 1, 128>}, {pipeline_mode = #tpu.pipeline_mode<synchronous>, transform_indices = @transform_7, window_bounds = array<i64: 128, 128>}, {pipeline_mode = #tpu.pipeline_mode<synchronous>, transform_indices = @transform_8, window_bounds = array<i64: 1, 128>}, {transform_indices = @transform_9, window_bounds = array<i64: 16, 128>}]} {
    %c0 = arith.constant 0 : index
    %c0_0 = arith.constant 0 : index
    %0 = vector.load %arg1[%c0, %c0_0] : memref<16x16xbf16, #tpu.memory_space<vmem>>, vector<16x16xbf16>
    %1 = arith.extf %0 : vector<16x16xbf16> to vector<16x16xf32>
    %c0_1 = arith.constant 0 : index
    %c0_2 = arith.constant 0 : index
    %2 = vector.load %arg2[%c0_1, %c0_2] : memref<16x32xbf16, #tpu.memory_space<vmem>>, vector<16x32xbf16>
    %3 = arith.extf %2 : vector<16x32xbf16> to vector<16x32xf32>
    %c0_3 = arith.constant 0 : index
    %c0_4 = arith.constant 0 : index
    %4 = vector.load %arg3[%c0_3, %c0_4] : memref<16x128xf32, #tpu.memory_space<vmem>>, vector<16x128xf32>
    %cst = arith.constant dense<0.000000e+00> : vector<16x128xf32>
    %5 = tpu.matmul %1, %4, %cst {dimension_numbers = #tpu.dot_dimension_numbers<[1], [0], [0], [1], [0, 0, 1, 1], [], []>} : vector<16x16xf32>, vector<16x128xf32>, vector<16x128xf32> -> vector<16x128xf32>
    %c0_5 = arith.constant 0 : index
    %c0_6 = arith.constant 0 : index
    %6 = vector.load %arg4[%c0_5, %c0_6] : memref<32x128xf32, #tpu.memory_space<vmem>>, vector<32x128xf32>
    %cst_7 = arith.constant dense<0.000000e+00> : vector<16x128xf32>
    %7 = tpu.matmul %3, %6, %cst_7 {dimension_numbers = #tpu.dot_dimension_numbers<[1], [0], [0], [1], [0, 0, 1, 1], [], []>} : vector<16x32xf32>, vector<32x128xf32>, vector<16x128xf32> -> vector<16x128xf32>
    %8 = arith.addf %5, %7 : vector<16x128xf32>
    %c0_8 = arith.constant 0 : index
    %c0_9 = arith.constant 0 : index
    %9 = vector.load %arg5[%c0_8, %c0_9] : memref<1x128xf32, #tpu.memory_space<vmem>>, vector<1x128xf32>
    %10 = vector.broadcast %9 : vector<1x128xf32> to vector<16x128xf32>
    %11 = arith.addf %8, %10 : vector<16x128xf32>
    %12 = math.tanh %11 : vector<16x128xf32>
    %c0_10 = arith.constant 0 : index
    %c0_11 = arith.constant 0 : index
    %13 = vector.load %arg6[%c0_10, %c0_11] : memref<128x128xf32, #tpu.memory_space<vmem>>, vector<128x128xf32>
    %cst_12 = arith.constant dense<0.000000e+00> : vector<16x128xf32>
    %14 = tpu.matmul %12, %13, %cst_12 {dimension_numbers = #tpu.dot_dimension_numbers<[1], [0], [0], [1], [0, 0, 1, 1], [], []>} : vector<16x128xf32>, vector<128x128xf32>, vector<16x128xf32> -> vector<16x128xf32>
    %c0_13 = arith.constant 0 : index
    %c0_14 = arith.constant 0 : index
    %15 = vector.load %arg7[%c0_13, %c0_14] : memref<1x128xf32, #tpu.memory_space<vmem>>, vector<1x128xf32>
    %16 = vector.broadcast %15 : vector<1x128xf32> to vector<16x128xf32>
    %17 = arith.addf %14, %16 : vector<16x128xf32>
    %18 = math.tanh %17 : vector<16x128xf32>
    %c0_15 = arith.constant 0 : index
    %c0_16 = arith.constant 0 : index
    %19 = vector.load %arg8[%c0_15, %c0_16] : memref<128x128xf32, #tpu.memory_space<vmem>>, vector<128x128xf32>
    %cst_17 = arith.constant dense<0.000000e+00> : vector<16x128xf32>
    %20 = tpu.matmul %18, %19, %cst_17 {dimension_numbers = #tpu.dot_dimension_numbers<[1], [0], [0], [1], [0, 0, 1, 1], [], []>} : vector<16x128xf32>, vector<128x128xf32>, vector<16x128xf32> -> vector<16x128xf32>
    %c0_18 = arith.constant 0 : index
    %c0_19 = arith.constant 0 : index
    %21 = vector.load %arg9[%c0_18, %c0_19] : memref<1x128xf32, #tpu.memory_space<vmem>>, vector<1x128xf32>
    %22 = vector.broadcast %21 : vector<1x128xf32> to vector<16x128xf32>
    %23 = arith.addf %20, %22 : vector<16x128xf32>
    %c0_20 = arith.constant 0 : index
    %c0_21 = arith.constant 0 : index
    %24 = vector.load %arg10[%c0_20, %c0_21] : memref<16x128xf32, #tpu.memory_space<vmem>>, vector<16x128xf32>
    tpu.vector_store %arg10[%c0_20, %c0_21], %23 {strides = array<i32>} : memref<16x128xf32, #tpu.memory_space<vmem>>, vector<16x128xf32>,
    return
  }
  func.func @transform_0(%arg0: i32) -> (i32, i32) {
    %c0_i32 = arith.constant 0 : i32
    %c0_i32_0 = arith.constant 0 : i32
    return %arg0, %c0_i32 : i32, i32
  }
  func.func @transform_1(%arg0: i32) -> (i32, i32) {
    %c0_i32 = arith.constant 0 : i32
    %c0_i32_0 = arith.constant 0 : i32
    return %arg0, %c0_i32 : i32, i32
  }
  func.func @transform_2(%arg0: i32) -> (i32, i32) {
    %c0_i32 = arith.constant 0 : i32
    %c0_i32_0 = arith.constant 0 : i32
    %c0_i32_1 = arith.constant 0 : i32
    return %c0_i32, %c0_i32_0 : i32, i32
  }
  func.func @transform_3(%arg0: i32) -> (i32, i32) {
    %c0_i32 = arith.constant 0 : i32
    %c0_i32_0 = arith.constant 0 : i32
    %c0_i32_1 = arith.constant 0 : i32
    return %c0_i32, %c0_i32_0 : i32, i32
  }
  func.func @transform_4(%arg0: i32) -> (i32, i32) {
    %c0_i32 = arith.constant 0 : i32
    %c0_i32_0 = arith.constant 0 : i32
    %c0_i32_1 = arith.constant 0 : i32
    return %c0_i32, %c0_i32_0 : i32, i32
  }
  func.func @transform_5(%arg0: i32) -> (i32, i32) {
    %c0_i32 = arith.constant 0 : i32
    %c0_i32_0 = arith.constant 0 : i32
    %c0_i32_1 = arith.constant 0 : i32
    return %c0_i32, %c0_i32_0 : i32, i32
  }
  func.func @transform_6(%arg0: i32) -> (i32, i32) {
    %c0_i32 = arith.constant 0 : i32
    %c0_i32_0 = arith.constant 0 : i32
    %c0_i32_1 = arith.constant 0 : i32
    return %c0_i32, %c0_i32_0 : i32, i32
  }
  func.func @transform_7(%arg0: i32) -> (i32, i32) {
    %c0_i32 = arith.constant 0 : i32
    %c0_i32_0 = arith.constant 0 : i32
    %c0_i32_1 = arith.constant 0 : i32
    return %c0_i32, %c0_i32_0 : i32, i32
  }
  func.func @transform_8(%arg0: i32) -> (i32, i32) {
    %c0_i32 = arith.constant 0 : i32
    %c0_i32_0 = arith.constant 0 : i32
    %c0_i32_1 = arith.constant 0 : i32
    return %c0_i32, %c0_i32_0 : i32, i32
  }
  func.func @transform_9(%arg0: i32) -> (i32, i32) {
    %c0_i32 = arith.constant 0 : i32
    %c0_i32_0 = arith.constant 0 : i32
    return %arg0, %c0_i32 : i32, i32
  }
}

</mosaic_0001>

<bundles_post_ra>
// kernel: actor_critic_forward.1
= control target key start
LH: loop header
LB: loop body
LE: loop exit
PB: predicated region body
PF: predicated region fallthrough
CT: control target
= control target key end

     0   :  { %14 = vsyncpa [#allocation3], 0  ;;  %s863_s0 = inlined_call_operand.vmem [shape: bf16[16,16], index: 0, kind: input, shape index: {}]   ;;  %s864_s1 = inlined_call_operand.vmem [shape: bf16[16,32], index: 1, kind: input, shape index: {}]   ;;  %s865_s2 = inlined_call_operand.vmem [shape: f32[16,128], index: 2, kind: input, shape index: {}]   ;;  %s866_s3 = inlined_call_operand.vmem [shape: f32[32,128], index: 3, kind: input, shape index: {}]   ;;  %s867_s4 = inlined_call_operand.vmem [shape: f32[1,128], index: 4, kind: input, shape index: {}]   ;;  %s868_s5 = inlined_call_operand.hbm [shape: f32[128,128], index: 5, kind: input, shape index: {}]   ;;  %s869_s6 = inlined_call_operand.vmem [shape: f32[1,128], index: 6, kind: input, shape index: {}]   ;;  %s870_s7 = inlined_call_operand.hbm [shape: f32[128,128], index: 7, kind: input, shape index: {}]   ;;  %s871_s8 = inlined_call_operand.vmem [shape: f32[1,128], index: 8, kind: input, shape index: {}]   ;;  %s872_s9 = inlined_call_operand.vmem [shape: f32[16,128], index: 9, kind: output, shape index: {}]  }
   0x1   :  { %15 = vsyncpa [#allocation5], 0  ;;  %s742_s30 = smov [#allocation2]   ;;  %s694_s13 = scalar_lea.hbm %s868_s5, 2048 }
   0x2   :  { %s31_s10 = sshll.u32 %s742_s30, 4  ;;  %p695_p0 = scmp.ne.s32.totalorder %s868_s5, %s694_s13  ;;  %s32_s10 = int_to_ptr.vmem [resolvable:$true] %s31_s10 }
   0x3   :  { %p698_p1 = scmp.lt.u32.totalorder %s694_s13, %s868_s5 }
   0x5   :  { %p700_p2 = pnand %p698_p1, %p695_p0 }
   0x7   :  { %703 = shalt.err (!%p700_p2)
}
   0x8   :  { %s704_s18 = scalar_lea.vmem %s32_s10, 2048  ;;  %p709_p4 = scmp.lt.s32.totalorder %s32_s10, %s32_s10 }
   0x9   :  { %p705_p3 = scmp.ne.s32.totalorder %s32_s10, %s704_s18  ;;  %p710_p5 = scmp.lt.s32.totalorder %s704_s18, %s704_s18 }
   0xb   :  { %p711_p6 = por %p710_p5, %p709_p4 }
   0xd   :  { %p712_p7 = pnand %p711_p6, %p705_p3 }
   0xf   :  { %715 = shalt.err (!%p712_p7)
}
  0x10   :  { %s743_s19 = smov 128   ;;  %s744_s20 = smov 8  }
  0x11   :  { %37 = dma.hbm_to_vmem [thread:$0]  %s868_s5, 2048, %s32_s10, [#allocation3], %s743_s19, %s743_s19, %s744_s20  }
  0x12   :  { %s745_s23 = smov [#allocation4]   ;;  %s716_s27 = scalar_lea.hbm %s870_s7, 2048 }
  0x13   :  { %s45_s24 = sshll.u32 %s745_s23, 4  ;;  %p717_p8 = scmp.ne.s32.totalorder %s870_s7, %s716_s27  ;;  %s46_s24 = int_to_ptr.vmem [resolvable:$true] %s45_s24 }
  0x14   :  { %p720_p9 = scmp.lt.u32.totalorder %s716_s27, %s870_s7 }
  0x16   :  { %p722_p10 = pnand %p720_p9, %p717_p8 }
  0x18   :  { %725 = shalt.err (!%p722_p10)
}
  0x19   :  { %s726_s12 = scalar_lea.vmem %s46_s24, 2048  ;;  %p731_p12 = scmp.lt.s32.totalorder %s46_s24, %s46_s24 }
  0x1a   :  { %p727_p11 = scmp.ne.s32.totalorder %s46_s24, %s726_s12  ;;  %p732_p13 = scmp.lt.s32.totalorder %s726_s12, %s726_s12 }
  0x1c   :  { %p733_p0 = por %p732_p13, %p731_p12 }
  0x1e   :  { %p734_p1 = pnand %p733_p0, %p727_p11 }
  0x20   :  { %737 = shalt.err (!%p734_p1)
}
  0x21   :  { %51 = dma.hbm_to_vmem [thread:$0]  %s870_s7, 2048, %s46_s24, [#allocation5], %s743_s19, %s743_s19, %s744_s20  }
  0x22   :  { %738 = dma.done.wait [#allocation3], 2048  }
  0x23   :  { %739 = vsyncadd [#allocation3], 4294965248 }
  0x24   :  { %740 = dma.done.wait [#allocation5], 2048  }
  0x25   :  { %741 = vsyncadd [#allocation5], 4294965248  ;;  %v70_v0 = vld [vmem:[%s866_s3] sm:$0xff]  ;;  %v71_v1 = vld [vmem:[%s866_s3 + $0x8] sm:$0xff]  ;;  %vm156_vm0 = vcmask 130048   ;;  %vm74_vm1 = vcmask 261120  }
  0x26   :  { %v68_v2 = vld [vmem:[%s865_s2] sm:$0xff]  ;;  %v604_v3 = vpack.c.bf16 %v71_v1, %v70_v0  ;;  %v69_v4 = vld [vmem:[%s865_s2 + $0x8] sm:$0xff]  ;;  %v72_v5 = vld [vmem:[%s866_s3 + $0x10] sm:$0xff] }
  0x27   :  { %v73_v6 = vld [vmem:[%s866_s3 + $0x18] sm:$0xff]  ;;  %v612_v7 = vpack.c.bf16 %v69_v4, %v68_v2  ;;  %v463_v9 = vld [vmem:[%s863_s0] sm:$0xff]   ;;  %v250_v14 = vld [vmem:[#allocation2 + $0x8] sm:$0xff] }
  0x28   :  { %v608_v8 = vpack.c.bf16 %v73_v6, %v72_v5  ;;  %v467_v10 = vld [vmem:[%s864_s1] sm:$0xff]   ;;  %605 = vmatprep.subr.bf16.mxu1 %v604_v3  ;;  %v464_v12 = vunpack.c.l.bf16 %v463_v9  ;;  %v465_v15 = vunpack.c.h.bf16 %v463_v9  ;;  %v251_v17 = vld [vmem:[#allocation2 + $0x10] sm:$0xff]  ;;  %v252_v18 = vld [vmem:[#allocation2 + $0x18] sm:$0xff] }
  0x29   :  { %v249_v11 = vld [vmem:[#allocation2] sm:$0xff]  ;;  %v468_v13 = vunpack.c.l.bf16 %v467_v10  ;;  %607 = vmatpush3.bf16.msra.mxu1 %v604_v3  ;;  %613 = vmatprep.subr.bf16.mxu0 %v612_v7  ;;  %v469_v19 = vunpack.c.h.bf16 %v467_v10  ;;  %v620_v20 = vpack.c.bf16 %v252_v18, %v251_v17  ;;  %v254_v22 = vld [vmem:[#allocation2 + $0x28] sm:$0xff]  ;;  %v255_v24 = vld [vmem:[#allocation2 + $0x30] sm:$0xff] }
  0x2a   :  { %609 = vmatprep.subr.bf16.mxu1 %v608_v8  ;;  %615 = vmatpush3.bf16.msra.mxu0 %v612_v7  ;;  %v616_v16 = vpack.c.bf16 %v250_v14, %v249_v11  ;;  %v253_v21 = vld [vmem:[#allocation2 + $0x20] sm:$0xff]  ;;  %v256_v25 = vld [vmem:[#allocation2 + $0x38] sm:$0xff]  ;;  %v258_v28 = vld [vmem:[#allocation2 + $0x48] sm:$0xff] }
  0x2b   :  { %531 = vmatprep.mubr.msk.f32.mxu0 %vm156_vm0, %v464_v12  ;;  %524 = vmatprep.mubr.msk.f32.mxu1 %vm74_vm1, %v468_v13  ;;  %v624_v23 = vpack.c.bf16 %v254_v22, %v253_v21  ;;  %v628_v26 = vpack.c.bf16 %v256_v25, %v255_v24  ;;  %v257_v27 = vld [vmem:[#allocation2 + $0x40] sm:$0xff]  ;;  %v259_v30 = vld [vmem:[#allocation2 + $0x50] sm:$0xff]  ;;  %v260_v31 = vld [vmem:[#allocation2 + $0x58] sm:$0xff] }
  0x2c   :  { %v632_v29 = vpack.c.bf16 %v258_v28, %v257_v27  ;;  %v636_v32 = vpack.c.bf16 %v260_v31, %v259_v30  ;;  %v261_v33 = vld [vmem:[#allocation2 + $0x60] sm:$0xff]  ;;  %v262_v34 = vld [vmem:[#allocation2 + $0x68] sm:$0xff]  ;;  %v263_v35 = vld [vmem:[#allocation2 + $0x70] sm:$0xff] }
  0x2d   :  { %611 = vmatpush3.bf16.msra.mxu1 %v608_v8  ;;  %532 = vmatmul.mubr.msk.f32.vlgmr.msra.gmra.mrb[0].mxu0 %vm156_vm0, %v465_v15  ;;  %v640_v36 = vpack.c.bf16 %v262_v34, %v261_v33  ;;  %v264_v37 = vld [vmem:[#allocation2 + $0x78] sm:$0xff]  ;;  %v349_v39 = vld [vmem:[#allocation4] sm:$0xff]  ;;  %v350_v40 = vld [vmem:[#allocation4 + $0x8] sm:$0xff] }
  0x2e   :  { %617 = vmatprep.subr.bf16.mxu1 %v616_v16  ;;  %v644_v38 = vpack.c.bf16 %v264_v37, %v263_v35  ;;  %v351_v41 = vld [vmem:[#allocation4 + $0x10] sm:$0xff]  ;;  %v648_v42 = vpack.c.bf16 %v350_v40, %v349_v39  ;;  %v352_v43 = vld [vmem:[#allocation4 + $0x18] sm:$0xff]  ;;  %v353_v45 = vld [vmem:[#allocation4 + $0x20] sm:$0xff] }
  0x2f   :  { %v652_v44 = vpack.c.bf16 %v352_v43, %v351_v41  ;;  %v354_v46 = vld [vmem:[#allocation4 + $0x28] sm:$0xff]  ;;  %v355_v48 = vld [vmem:[#allocation4 + $0x30] sm:$0xff]  ;;  %v356_v49 = vld [vmem:[#allocation4 + $0x38] sm:$0xff] }
  0x30   :  { %525 = vmatmul.mubr.msk.f32.vlgmr.msra.gmra.mrb[0].mxu1 %vm74_vm1, %v469_v19  ;;  %649 = vmatprep.subr.bf16.mxu0 %v648_v42  ;;  %v656_v47 = vpack.c.bf16 %v354_v46, %v353_v45  ;;  %v660_v50 = vpack.c.bf16 %v356_v49, %v355_v48  ;;  %v459_v54 = vld [vmem:[%s867_s4] ss:$0 sm:$0xff]  ;;  %v358_v63 = vld [vmem:[#allocation4 + $0x48] sm:$0xff]  ;;  %v359_v1 = vld [vmem:[#allocation4 + $0x50] sm:$0xff] }
  0x31   :  { %619 = vmatpush3.bf16.msra.mxu1 %v616_v16  ;;  %651 = vmatpush3.bf16.msra.mxu0 %v648_v42  ;;  %v357_v62 = vld [vmem:[#allocation4 + $0x40] sm:$0xff]  ;;  %v360_v2 = vld [vmem:[#allocation4 + $0x58] sm:$0xff]  ;;  %v362_v5 = vld [vmem:[#allocation4 + $0x68] sm:$0xff] }
  0x32   :  { %621 = vmatprep.subr.bf16.mxu1 %v620_v20  ;;  %653 = vmatprep.subr.bf16.mxu0 %v652_v44  ;;  %v664_v0 = vpack.c.bf16 %v358_v63, %v357_v62  ;;  %v668_v3 = vpack.c.bf16 %v360_v2, %v359_v1  ;;  %v361_v4 = vld [vmem:[#allocation4 + $0x60] sm:$0xff]  ;;  %v363_v6 = vld [vmem:[#allocation4 + $0x70] sm:$0xff]  ;;  %v364_v8 = vld [vmem:[#allocation4 + $0x78] sm:$0xff] }
  0x33   :  { %v672_v7 = vpack.c.bf16 %v362_v5, %v361_v4  ;;  %v676_v9 = vpack.c.bf16 %v364_v8, %v363_v6  ;;  %v460_v10 = vld [vmem:[%s869_s6] ss:$0 sm:$0xff] }
  0x34   :  { %v461_v17 = vld [vmem:[%s871_s8] ss:$0 sm:$0xff] }
  0x35   :  { %623 = vmatpush3.bf16.msra.mxu1 %v620_v20  ;;  %655 = vmatpush3.bf16.msra.mxu0 %v652_v44 }
  0x36   :  { %625 = vmatprep.subr.bf16.mxu1 %v624_v23  ;;  %657 = vmatprep.subr.bf16.mxu0 %v656_v47 }
  0x39   :  { %627 = vmatpush3.bf16.msra.mxu1 %v624_v23  ;;  %659 = vmatpush3.bf16.msra.mxu0 %v656_v47 }
  0x3a   :  { %629 = vmatprep.subr.bf16.mxu1 %v628_v26  ;;  %661 = vmatprep.subr.bf16.mxu0 %v660_v50 }
  0x3d   :  { %631 = vmatpush3.bf16.msra.mxu1 %v628_v26  ;;  %663 = vmatpush3.bf16.msra.mxu0 %v660_v50 }
  0x3e   :  { %633 = vmatprep.subr.bf16.mxu1 %v632_v29  ;;  %665 = vmatprep.subr.bf16.mxu0 %v664_v0 }
  0x41   :  { %635 = vmatpush3.bf16.msra.mxu1 %v632_v29  ;;  %667 = vmatpush3.bf16.msra.mxu0 %v664_v0 }
  0x42   :  { %637 = vmatprep.subr.bf16.mxu1 %v636_v32  ;;  %669 = vmatprep.subr.bf16.mxu0 %v668_v3 }
  0x45   :  { %639 = vmatpush3.bf16.msra.mxu1 %v636_v32  ;;  %671 = vmatpush3.bf16.msra.mxu0 %v668_v3 }
  0x46   :  { %641 = vmatprep.subr.bf16.mxu1 %v640_v36  ;;  %673 = vmatprep.subr.bf16.mxu0 %v672_v7 }
  0x49   :  { %643 = vmatpush3.bf16.msra.mxu1 %v640_v36  ;;  %675 = vmatpush3.bf16.msra.mxu0 %v672_v7 }
  0x4a   :  { %645 = vmatprep.subr.bf16.mxu1 %v644_v38  ;;  %677 = vmatprep.subr.bf16.mxu0 %v676_v9 }
  0x4d   :  { %647 = vmatpush3.bf16.msra.mxu1 %v644_v38  ;;  %679 = vmatpush3.bf16.msra.mxu0 %v676_v9 }
 0x100   :  { %v533_v51 = vpop.f32.mrb[0].mxu0 }
 0x101   :  { %v229_v52 = vpop.f32.mrb[1].mxu0 }
 0x103   :  { %v526_v53 = vpop.f32.mrb[0].mxu1 }
 0x104   :  { %v235_v55 = vadd.f32 %v533_v51, %v526_v53  ;;  %v147_v56 = vpop.f32.mrb[1].mxu1 }
 0x105   :  { %v230_v57 = vadd.f32 %v229_v52, %v147_v56 }
 0x106   :  { %v246_v58 = vadd.f32 %v459_v54, %v235_v55 }
 0x107   :  { %v245_v59 = vadd.f32 %v459_v54, %v230_v57 }
 0x109   :  { %686 = vtanh.f32 %v245_v59 }
 0x10a   :  { %688 = vtanh.f32 %v246_v58 }
 0x113   :  { %v687_v60 = vpop.eup %686 }
 0x114   :  { %v689_v61 = vpop.eup %688  ;;  %566 = vmatprep.mubr.f32.mxu1 %v687_v60 }
 0x115   :  { %567 = vmatmul.mubr.f32.vlgmr.msra.gmra.mrb[2].mxu1 %v689_v61 }
 0x1e8   :  { %v568_v11 = vpop.f32.mrb[2].mxu1 }
 0x1e9   :  { %v344_v12 = vadd.f32 %v568_v11, %v460_v10  ;;  %v338_v13 = vpop.f32.mrb[3].mxu1 }
 0x1ea   :  { %v339_v14 = vadd.f32 %v460_v10, %v338_v13 }
 0x1ec   :  { %690 = vtanh.f32 %v339_v14 }
 0x1ed   :  { %692 = vtanh.f32 %v344_v12 }
 0x1f6   :  { %v691_v15 = vpop.eup %690 }
 0x1f7   :  { %v693_v16 = vpop.eup %692  ;;  %601 = vmatprep.mubr.f32.mxu0 %v691_v15 }
 0x1f8   :  { %602 = vmatmul.mubr.f32.vlgmr.msra.gmra.mrb[2].mxu0 %v693_v16 }
 0x2cb   :  { %v603_v18 = vpop.f32.mrb[2].mxu0 }
 0x2cc   :  { %v444_v19 = vadd.f32 %v603_v18, %v461_v17  ;;  %v438_v20 = vpop.f32.mrb[3].mxu0 }
 0x2cd   :  { %v439_v21 = vadd.f32 %v461_v17, %v438_v20 }
 0x2ce   :  { %448 = vst [vmem:[%s872_s9 + $0x8] sm:$0xff] %v444_v19 }
 0x2cf   :  { %447 = vst [vmem:[%s872_s9] sm:$0xff] %v439_v21 }
 0x2d0   :  { %453 = vsyncpa [#allocation3], 1 }
 0x2d1   :  { %454 = vsyncpa [#allocation5], 1 }

</bundles_post_ra>
